<compile_context>
chip_gen: v7x
topology: tpu7x:2x2x1
jax: 0.10.0
libtpu: 0.0.40
codegen_flags: <defaults>
</compile_context>

<pallas_src>
import functools

import jax
import jax.numpy as jnp
from jax.experimental import pallas as pl
from jax.experimental.pallas import tpu as pltpu


# ----------------------------------------------------------------------------
# Glue: bilinear interpolation with align_corners=True (matches F.interpolate).
# Gather-based resize of a tiny (B,1,h,w) map -- kept in plain JAX.
# ----------------------------------------------------------------------------
def bilinear_align_corners(g, out_h, out_w):
    """g: (B, 1, h, w) -> (B, 1, out_h, out_w), align_corners=True."""
    B, C1, h, w = g.shape
    ys = jnp.linspace(0.0, float(h - 1), out_h) if out_h > 1 else jnp.zeros((1,), g.dtype)
    xs = jnp.linspace(0.0, float(w - 1), out_w) if out_w > 1 else jnp.zeros((1,), g.dtype)
    y0 = jnp.floor(ys).astype(jnp.int32)
    x0 = jnp.floor(xs).astype(jnp.int32)
    y1 = jnp.minimum(y0 + 1, h - 1)
    x1 = jnp.minimum(x0 + 1, w - 1)
    wy = (ys - y0.astype(g.dtype))[None, None, :, None]
    wx = (xs - x0.astype(g.dtype))[None, None, None, :]
    g00 = g[:, :, y0][:, :, :, x0]
    g01 = g[:, :, y0][:, :, :, x1]
    g10 = g[:, :, y1][:, :, :, x0]
    g11 = g[:, :, y1][:, :, :, x1]
    return (g00 * (1 - wy) * (1 - wx) + g01 * (1 - wy) * wx +
            g10 * wy * (1 - wx) + g11 * wy * wx)


# ----------------------------------------------------------------------------
# Stage 1: fused Q/K/V projection + modulation.  grid = (B, HW//TP).
# ----------------------------------------------------------------------------
def cgm_proj_kernel(x_ref, m_ref, w_ref, b_ref, q_ref, k_ref, v_ref,
                    *, c8p, c, cp1):
    # Fused 1x1 conv: W_all^T . x tile (bf16 MXU operands, f32 accumulation).
    proj = jax.lax.dot_general(
        w_ref[...], x_ref[0], (((0,), (0,)), ((), ())),
        preferred_element_type=jnp.float32) + b_ref[...]      # (2*c8p+c, TP)
    proj = proj * m_ref[0]                                     # guided modulation
    q_ref[0] = proj[:c8p].astype(jnp.bfloat16)                 # (c8p, TP)
    k_ref[0] = proj[c8p:2 * c8p].astype(jnp.bfloat16)          # (c8p, TP)
    v_ref[0, :c, :] = proj[2 * c8p:].astype(jnp.bfloat16)      # (c,   TP)
    # Row c of v^T is all-ones (fused softmax denominator); remaining pad rows
    # are zero so they never contribute to the accumulator.
    tp = x_ref.shape[2]
    row = jax.lax.broadcasted_iota(jnp.int32, (cp1 - c, tp), 0)
    v_ref[0, c:, :] = (row == 0).astype(jnp.bfloat16)


# ----------------------------------------------------------------------------
# Stage 2: flash-style guided attention.  grid = (B, HW//TQ, HW//TK).
# ----------------------------------------------------------------------------
def cgm_attn_kernel(x_ref, q_ref, k_ref, v_ref, gamma_ref, o_ref,
                    m_sc, acc_sc, *, c, exp_dtype):
    ki = pl.program_id(2)
    nk = pl.num_programs(2)

    @pl.when(ki == 0)
    def _init():
        m_sc[...] = jnp.full_like(m_sc, -jnp.inf)
        acc_sc[...] = jnp.zeros_like(acc_sc)

    # Energy tile, transposed layout (TK, TQ): energy_T[j, i] = k_j . q_i.
    # bf16 MXU operands, f32 accumulation; no explicit transpose materialized.
    energy = jax.lax.dot_general(
        k_ref[0], q_ref[0], (((0,), (0,)), ((), ())),
        preferred_element_type=jnp.float32)                    # (TK, TQ) f32

    # Online softmax over the kv axis (axis 0).
    m_prev = m_sc[...]                                         # (1, TQ)
    m_new = jnp.maximum(m_prev, jnp.max(energy, axis=0, keepdims=True))
    alpha = jnp.exp(m_prev - m_new)                            # (1, TQ) f32
    p = jnp.exp((energy - m_new).astype(exp_dtype))            # bf16 on v6e/v7x
    # Fused accumulate: rows [0,c) are sum_j v[c,j]*p[j,i]; row c is sum_j p[j,i]
    # (the softmax denominator, via the ones row) -- no cross-sublane sum needed.
    acc_sc[...] = alpha * acc_sc[...] + jax.lax.dot_general(
        v_ref[0], p.astype(jnp.bfloat16), (((1,), (0,)), ((), ())),
        preferred_element_type=jnp.float32)                    # (Cp1, TQ)
    m_sc[...] = m_new

    @pl.when(ki == nk - 1)
    def _finalize():
        inv_l = 1.0 / acc_sc[c:c + 1, :]        # exact reciprocal, once per q tile
        o_ref[0] = gamma_ref[0, 0] * (acc_sc[:c, :] * inv_l) + x_ref[0]


# ----------------------------------------------------------------------------
# Chip-aware configuration helpers.
# ----------------------------------------------------------------------------
def _round_up(x, m):
    return ((x + m - 1) // m) * m


def _vmem_capacity():
    try:
        return int(pltpu.get_tpu_info().vmem_capacity_bytes)
    except Exception:
        return 64 << 20          # conservative fallback (v7x per-TC size)


def _exp_dtype():
    # bf16 EUP exp only where the hardware supports it (v6e / v7x).
    try:
        kind = jax.devices()[0].device_kind.lower()
    except Exception:
        return jnp.float32
    if ("v6" in kind) or ("v7" in kind) or ("7x" in kind):
        return jnp.bfloat16
    return jnp.float32


def _pick_tiles(hw, batch, vmem_cap):
    if vmem_cap >= (96 << 20):           # v5e / v6e: 128 MiB physical VMEM
        tq_prefs, tk_prefs = (2048, 1024, 512, 256, 128), (1024, 512, 256, 128)
    else:                                # v7x: 64 MiB per TensorCore
        tq_prefs, tk_prefs = (1024, 512, 256, 128), (512, 256, 128)
    tq = next((t for t in tq_prefs if hw % t == 0), hw)
    tk = next((t for t in tk_prefs if hw % t == 0), hw)
    # Keep B*nq >= 2 so both v7x TensorCores get work.
    if batch * (hw // tq) < 2 and tq > 128 and hw % (tq // 2) == 0:
        tq //= 2
    return tq, tk


# ----------------------------------------------------------------------------
# Wrapper: packs weights, runs projection then attention pallas_calls.
# ----------------------------------------------------------------------------
@functools.partial(jax.jit, static_argnames=("tq", "tk"))
def change_guide_module(x, guiding_map0, wq, bq, wk, bk, wv, bv, gamma,
                        *, tq=None, tk=None):
    """x: (B, C, H, W) NCHW; guiding_map0: (B, 1, h, w).  Returns NCHW."""
    B, C, H, W = x.shape
    HW = H * W
    C8 = wq.shape[1]
    C8p = _round_up(C8, 8)               # pad q/k channels to 8 sublanes
    Cp1 = _round_up(C + 1, 8)            # value rows + ones row, sublane padded

    vmem_cap = _vmem_capacity()
    exp_dtype = _exp_dtype()
    if tq is None or tk is None:
        atq, atk = _pick_tiles(HW, B, vmem_cap)
        tq = atq if tq is None else tq
        tk = atk if tk is None else tk
    assert HW % tq == 0 and HW % tk == 0, "H*W must be divisible by the tiles"

    f32, bf16 = jnp.float32, jnp.bfloat16
    x_f32 = x.astype(f32).reshape(B, C, HW)            # residual stream (no transpose)
    x_bf = x_f32.astype(bf16)                          # projection input (half DMA bytes)
    # Hoisted guide modulation: 1 + sigmoid(resized guide), computed once.
    mod = (1.0 + jax.nn.sigmoid(
        bilinear_align_corners(guiding_map0.astype(f32), H, W))).reshape(B, 1, HW)

    # Pack weights: Wq|Wk padded to C8p columns, fused with Wv into one matmul.
    pad = C8p - C8
    w_all = jnp.concatenate(
        [jnp.pad(wq.astype(f32), ((0, 0), (0, pad))),
         jnp.pad(wk.astype(f32), ((0, 0), (0, pad))),
         wv.astype(f32)], axis=1).astype(bf16)          # (C, 2*C8p + C) bf16
    b_all = jnp.concatenate(
        [jnp.pad(bq.astype(f32), ((0, pad),)),
         jnp.pad(bk.astype(f32), ((0, pad),)),
         bv.astype(f32)], axis=0)[:, None]               # (2*C8p + C, 1) f32
    gamma_s = jnp.asarray(gamma, f32).reshape(1, 1)
    nrows = 2 * C8p + C

    # ---- Stage 1: projections (runs once per position) ----------------------
    tp = next((t for t in (512, 256, 128) if HW % t == 0), HW)
    proj_cost = pl.CostEstimate(
        flops=2 * B * HW * C * nrows,
        transcendentals=0,
        bytes_accessed=B * HW * (C * 2 + 4 + (2 * C8p + Cp1) * 2) + C * nrows * 2,
    )
    qT, kT, vT = pl.pallas_call(
        functools.partial(cgm_proj_kernel, c8p=C8p, c=C, cp1=Cp1),
        out_shape=(jax.ShapeDtypeStruct((B, C8p, HW), bf16),
                   jax.ShapeDtypeStruct((B, C8p, HW), bf16),
                   jax.ShapeDtypeStruct((B, Cp1, HW), bf16)),
        grid_spec=pltpu.PrefetchScalarGridSpec(
            num_scalar_prefetch=0,
            grid=(B, HW // tp),
            in_specs=[
                pl.BlockSpec((1, C, tp), lambda b, t: (b, 0, t)),   # x tile (bf16)
                pl.BlockSpec((1, 1, tp), lambda b, t: (b, 0, t)),   # modulation
                pl.BlockSpec((C, nrows), lambda b, t: (0, 0)),      # Wq|Wk|Wv fused
                pl.BlockSpec((nrows, 1), lambda b, t: (0, 0)),      # bq|bk|bv fused
            ],
            out_specs=[
                pl.BlockSpec((1, C8p, tp), lambda b, t: (b, 0, t)),  # q^T
                pl.BlockSpec((1, C8p, tp), lambda b, t: (b, 0, t)),  # k^T
                pl.BlockSpec((1, Cp1, tp), lambda b, t: (b, 0, t)),  # v^T (+ones row)
            ],
        ),
        compiler_params=pltpu.CompilerParams(
            dimension_semantics=("parallel", "parallel")),
        cost_estimate=proj_cost,
    )(x_bf, mod, w_all, b_all)

    # ---- Stage 2: flash attention --------------------------------------------
    nq, nk = HW // tq, HW // tk

    # VMEM budget: double-buffered blocks + scratch + energy/p temps, with
    # headroom, capped below physical VMEM on every chip (v7x = 64 MiB).
    p_bytes = jnp.dtype(exp_dtype).itemsize
    blk = 2 * (C * tq * 4 + C8p * tq * 2 + C8p * tk * 2 + Cp1 * tk * 2 + C * tq * 4)
    scr = 4 * (tq + Cp1 * tq)
    tmp = tq * tk * (4 + 4 + p_bytes)
    vmem_need = int(1.5 * (blk + scr + tmp)) + (4 << 20)
    vmem_limit = max(16 << 20, min(vmem_need, vmem_cap - (8 << 20)))

    attn_cost = pl.CostEstimate(
        flops=2 * B * HW * HW * (C8p + Cp1),
        transcendentals=B * HW * HW + B * nq * nk * tq,
        bytes_accessed=(B * HW * (C8p * 2 + C * 4 + C * 4)       # q^T, x residual, out
                        + B * nq * HW * (C8p + Cp1) * 2),        # k^T/v^T re-read per q tile
    )

    out_flat = pl.pallas_call(
        functools.partial(cgm_attn_kernel, c=C, exp_dtype=exp_dtype),
        out_shape=jax.ShapeDtypeStruct((B, C, HW), f32),
        grid_spec=pltpu.PrefetchScalarGridSpec(
            num_scalar_prefetch=0,
            grid=(B, nq, nk),
            in_specs=[
                pl.BlockSpec((1, C, tq), lambda b, qi, ki: (b, 0, qi)),    # x residual (f32)
                pl.BlockSpec((1, C8p, tq), lambda b, qi, ki: (b, 0, qi)),  # q^T (bf16)
                pl.BlockSpec((1, C8p, tk), lambda b, qi, ki: (b, 0, ki)),  # k^T (bf16)
                pl.BlockSpec((1, Cp1, tk), lambda b, qi, ki: (b, 0, ki)),  # v^T + ones (bf16)
                pl.BlockSpec(memory_space=pltpu.MemorySpace.SMEM),         # gamma scalar
            ],
            out_specs=pl.BlockSpec((1, C, tq), lambda b, qi, ki: (b, 0, qi)),
            scratch_shapes=[
                pltpu.VMEM((1, tq), f32),      # running max
                pltpu.VMEM((Cp1, tq), f32),    # fused accumulator (+ denominator row)
            ],
        ),
        compiler_params=pltpu.CompilerParams(
            dimension_semantics=("parallel", "parallel", "arbitrary"),
            vmem_limit_bytes=vmem_limit),
        cost_estimate=attn_cost,
    )(x_f32, qT, kT, vT, gamma_s)

    return out_flat.reshape(B, C, H, W)


# ----------------------------------------------------------------------------
# Pure-JAX reference (same math, f32) for verification.
# ----------------------------------------------------------------------------
def reference(x, guiding_map0, wq, bq, wk, bk, wv, bv, gamma):
    B, C, H, W = x.shape
    HW = H * W
    g = jax.nn.sigmoid(bilinear_align_corners(guiding_map0, H, W)).reshape(B, 1, HW)
    xf = x.reshape(B, C, HW)
    m = 1.0 + g
    q = (jnp.einsum('co,bch->boh', wq, xf) + bq[None, :, None]) * m   # (B, C8, HW)
    k = (jnp.einsum('co,bch->boh', wk, xf) + bk[None, :, None]) * m   # (B, C8, HW)
    v = (jnp.einsum('cd,bch->bdh', wv, xf) + bv[None, :, None]) * m   # (B, C, HW)
    energy = jnp.einsum('boi,boj->bij', q, k)                         # (B, HW, HW)
    att = jax.nn.softmax(energy, axis=-1)
    out = jnp.einsum('bcj,bij->bci', v, att)                          # (B, C, HW)
    o = gamma[0, 0] * out + xf
    return o.reshape(B, C, H, W)


if __name__ == "__main__":
    # Small shapes consistent with the module: in_dim divisible by 8.
    B, C, H, W = 2, 32, 16, 16
    C8 = C // 8
    gh, gw = 8, 8

    key = jax.random.PRNGKey(0)
    kx, kg, k1, k2, k3, k4, k5, k6 = jax.random.split(key, 8)

    x = jax.random.normal(kx, (B, C, H, W), dtype=jnp.float32)
    guiding_map0 = jax.random.normal(kg, (B, 1, gh, gw), dtype=jnp.float32)

    # PyTorch Conv2d weights are (out, in, 1, 1); stored here as (in, out).
    wq = 0.1 * jax.random.normal(k1, (C, C8), dtype=jnp.float32)
    bq = 0.1 * jax.random.normal(k2, (C8,), dtype=jnp.float32)
    wk = 0.1 * jax.random.normal(k3, (C, C8), dtype=jnp.float32)
    bk = 0.1 * jax.random.normal(k4, (C8,), dtype=jnp.float32)
    wv = 0.1 * jax.random.normal(k5, (C, C), dtype=jnp.float32)
    bv = 0.1 * jax.random.normal(k6, (C,), dtype=jnp.float32)
    # nn.Parameter(torch.zeros(1)) inits gamma to 0; use a nonzero value so the
    # attention branch actually contributes to the verified output.
    gamma = jnp.full((1, 1), 0.25, dtype=jnp.float32)

    # tq/tk = 128 -> attention grid (2, 2, 2): exercises the multi-tile online softmax.
    out = change_guide_module(x, guiding_map0, wq, bq, wk, bk, wv, bv, gamma,
                              tq=128, tk=128)
    out = jax.block_until_ready(out)

    ref = reference(x, guiding_map0, wq, bq, wk, bk, wv, bv, gamma)
    assert out.shape == (B, C, H, W)
    # Known precision tradeoff: bf16 MXU operands for the projections, energy
    # and attention@value matmuls (and bf16 exp on v6e/v7x) -> relaxed tolerance
    # vs the all-f32 reference.
    assert jnp.allclose(out, ref, atol=4e-2, rtol=4e-2), (
        float(jnp.max(jnp.abs(out - ref))))

    print("KERNEL_OK")
</pallas_src>

<mosaic_0001>
module attributes {stable_mosaic.version = 11 : i64} {
  func.func @cgm_proj_kernel(%arg0: i32, %arg1: i32, %arg2: memref<1x32x256xbf16, #tpu.memory_space<vmem>>, %arg3: memref<1x1x256xf32, #tpu.memory_space<vmem>>, %arg4: memref<32x48xbf16, #tpu.memory_space<vmem>>, %arg5: memref<48x1xf32, #tpu.memory_space<vmem>>, %arg6: memref<1x8x256xbf16, #tpu.memory_space<vmem>>, %arg7: memref<1x8x256xbf16, #tpu.memory_space<vmem>>, %arg8: memref<1x40x256xbf16, #tpu.memory_space<vmem>>) attributes {dimension_semantics = [#tpu.dimension_semantics<parallel>, #tpu.dimension_semantics<parallel>], iteration_bounds = array<i64: 2, 1>, scalar_prefetch = 0 : i64, scratch_operands = 0 : i64, tpu.core_type = #tpu.core_type<tc>, window_params = [{transform_indices = @transform_0, window_bounds = array<i64: 1, 32, 256>}, {transform_indices = @transform_1, window_bounds = array<i64: 1, 1, 256>}, {pipeline_mode = #tpu.pipeline_mode<synchronous>, transform_indices = @transform_2, window_bounds = array<i64: 32, 48>}, {pipeline_mode = #tpu.pipeline_mode<synchronous>, transform_indices = @transform_3, window_bounds = array<i64: 48, 1>}, {transform_indices = @transform_4, window_bounds = array<i64: 1, 8, 256>}, {transform_indices = @transform_5, window_bounds = array<i64: 1, 8, 256>}, {transform_indices = @transform_6, window_bounds = array<i64: 1, 40, 256>}]} {
    %c0 = arith.constant 0 : index
    %c0_0 = arith.constant 0 : index
    %0 = vector.load %arg4[%c0, %c0_0] : memref<32x48xbf16, #tpu.memory_space<vmem>>, vector<32x48xbf16>
    %c0_1 = arith.constant 0 : index
    %c0_2 = arith.constant 0 : index
    %c0_3 = arith.constant 0 : index
    %1 = vector.load %arg2[%c0_1, %c0_2, %c0_3] : memref<1x32x256xbf16, #tpu.memory_space<vmem>>, vector<1x32x256xbf16>
    %2 = vector.shape_cast %1 : vector<1x32x256xbf16> to vector<32x256xbf16>
    %cst = arith.constant dense<0.000000e+00> : vector<48x256xf32>
    %3 = tpu.matmul %0, %2, %cst {dimension_numbers = #tpu.dot_dimension_numbers<[0], [0], [1], [1], [0, 1, 1, 1], [], []>} : vector<32x48xbf16>, vector<32x256xbf16>, vector<48x256xf32> -> vector<48x256xf32>
    %c0_4 = arith.constant 0 : index
    %c0_5 = arith.constant 0 : index
    %4 = vector.load %arg5[%c0_4, %c0_5] : memref<48x1xf32, #tpu.memory_space<vmem>>, vector<48x1xf32>
    %5 = vector.broadcast %4 : vector<48x1xf32> to vector<48x256xf32>
    %6 = arith.addf %3, %5 : vector<48x256xf32>
    %c0_6 = arith.constant 0 : index
    %c0_7 = arith.constant 0 : index
    %c0_8 = arith.constant 0 : index
    %7 = vector.load %arg3[%c0_6, %c0_7, %c0_8] : memref<1x1x256xf32, #tpu.memory_space<vmem>>, vector<1x1x256xf32>
    %8 = vector.shape_cast %7 : vector<1x1x256xf32> to vector<1x256xf32>
    %9 = vector.broadcast %8 : vector<1x256xf32> to vector<48x256xf32>
    %10 = arith.mulf %6, %9 : vector<48x256xf32>
    %11 = vector.extract_strided_slice %10 {offsets = [0, 0], sizes = [8, 256], strides = [1, 1]} : vector<48x256xf32> to vector<8x256xf32>
    %12 = arith.truncf %11 : vector<8x256xf32> to vector<8x256xbf16>
    %c0_9 = arith.constant 0 : index
    %c0_10 = arith.constant 0 : index
    %c0_11 = arith.constant 0 : index
    %13 = vector.load %arg6[%c0_9, %c0_10, %c0_11] : memref<1x8x256xbf16, #tpu.memory_space<vmem>>, vector<1x8x256xbf16>
    %14 = vector.shape_cast %13 : vector<1x8x256xbf16> to vector<8x256xbf16>
    %15 = vector.shape_cast %12 : vector<8x256xbf16> to vector<1x8x256xbf16>
    tpu.vector_store %arg6[%c0_9, %c0_10, %c0_11], %15 {strides = array<i32>} : memref<1x8x256xbf16, #tpu.memory_space<vmem>>, vector<1x8x256xbf16>,
    %16 = vector.extract_strided_slice %10 {offsets = [8, 0], sizes = [8, 256], strides = [1, 1]} : vector<48x256xf32> to vector<8x256xf32>
    %17 = arith.truncf %16 : vector<8x256xf32> to vector<8x256xbf16>
    %c0_12 = arith.constant 0 : index
    %c0_13 = arith.constant 0 : index
    %c0_14 = arith.constant 0 : index
    %18 = vector.load %arg7[%c0_12, %c0_13, %c0_14] : memref<1x8x256xbf16, #tpu.memory_space<vmem>>, vector<1x8x256xbf16>
    %19 = vector.shape_cast %18 : vector<1x8x256xbf16> to vector<8x256xbf16>
    %20 = vector.shape_cast %17 : vector<8x256xbf16> to vector<1x8x256xbf16>
    tpu.vector_store %arg7[%c0_12, %c0_13, %c0_14], %20 {strides = array<i32>} : memref<1x8x256xbf16, #tpu.memory_space<vmem>>, vector<1x8x256xbf16>,
    %21 = vector.extract_strided_slice %10 {offsets = [16, 0], sizes = [32, 256], strides = [1, 1]} : vector<48x256xf32> to vector<32x256xf32>
    %22 = arith.truncf %21 : vector<32x256xf32> to vector<32x256xbf16>
    %c0_15 = arith.constant 0 : index
    %c0_16 = arith.constant 0 : index
    %c0_17 = arith.constant 0 : index
    %23 = vector.load %arg8[%c0_15, %c0_16, %c0_17] : memref<1x40x256xbf16, #tpu.memory_space<vmem>>, vector<1x32x256xbf16>
    %24 = vector.shape_cast %23 : vector<1x32x256xbf16> to vector<32x256xbf16>
    %25 = vector.shape_cast %22 : vector<32x256xbf16> to vector<1x32x256xbf16>
    tpu.vector_store %arg8[%c0_15, %c0_16, %c0_17], %25 {strides = array<i32>} : memref<1x40x256xbf16, #tpu.memory_space<vmem>>, vector<1x32x256xbf16>,
    %26 = tpu.iota {dimensions = array<i32: 0>} : vector<8x256xi32>
    %c0_i32 = arith.constant 0 : i32
    %27 = vector.broadcast %c0_i32 : i32 to vector<8x256xi32>
    %28 = arith.cmpi eq, %26, %27 : vector<8x256xi32>
    %29 = arith.extui %28 : vector<8x256xi1> to vector<8x256xi32>
    %30 = arith.sitofp %29 : vector<8x256xi32> to vector<8x256xf32>
    %31 = arith.truncf %30 : vector<8x256xf32> to vector<8x256xbf16>
    %c0_18 = arith.constant 0 : index
    %c32 = arith.constant 32 : index
    %c0_19 = arith.constant 0 : index
    %32 = vector.load %arg8[%c0_18, %c32, %c0_19] : memref<1x40x256xbf16, #tpu.memory_space<vmem>>, vector<1x8x256xbf16>
    %33 = vector.shape_cast %32 : vector<1x8x256xbf16> to vector<8x256xbf16>
    %34 = vector.shape_cast %31 : vector<8x256xbf16> to vector<1x8x256xbf16>
    tpu.vector_store %arg8[%c0_18, %c32, %c0_19], %34 {strides = array<i32>} : memref<1x40x256xbf16, #tpu.memory_space<vmem>>, vector<1x8x256xbf16>,
    return
  }
  func.func @transform_0(%arg0: i32, %arg1: i32) -> (i32, i32, i32) {
    %c0_i32 = arith.constant 0 : i32
    %c0_i32_0 = arith.constant 0 : i32
    return %arg0, %c0_i32, %arg1 : i32, i32, i32
  }
  func.func @transform_1(%arg0: i32, %arg1: i32) -> (i32, i32, i32) {
    %c0_i32 = arith.constant 0 : i32
    %c0_i32_0 = arith.constant 0 : i32
    return %arg0, %c0_i32, %arg1 : i32, i32, i32
  }
  func.func @transform_2(%arg0: i32, %arg1: i32) -> (i32, i32) {
    %c0_i32 = arith.constant 0 : i32
    %c0_i32_0 = arith.constant 0 : i32
    %c0_i32_1 = arith.constant 0 : i32
    return %c0_i32, %c0_i32_0 : i32, i32
  }
  func.func @transform_3(%arg0: i32, %arg1: i32) -> (i32, i32) {
    %c0_i32 = arith.constant 0 : i32
    %c0_i32_0 = arith.constant 0 : i32
    %c0_i32_1 = arith.constant 0 : i32
    return %c0_i32, %c0_i32_0 : i32, i32
  }
  func.func @transform_4(%arg0: i32, %arg1: i32) -> (i32, i32, i32) {
    %c0_i32 = arith.constant 0 : i32
    %c0_i32_0 = arith.constant 0 : i32
    return %arg0, %c0_i32, %arg1 : i32, i32, i32
  }
  func.func @transform_5(%arg0: i32, %arg1: i32) -> (i32, i32, i32) {
    %c0_i32 = arith.constant 0 : i32
    %c0_i32_0 = arith.constant 0 : i32
    return %arg0, %c0_i32, %arg1 : i32, i32, i32
  }
  func.func @transform_6(%arg0: i32, %arg1: i32) -> (i32, i32, i32) {
    %c0_i32 = arith.constant 0 : i32
    %c0_i32_0 = arith.constant 0 : i32
    return %arg0, %c0_i32, %arg1 : i32, i32, i32
  }
}

module attributes {stable_mosaic.version = 11 : i64} {
  func.func @cgm_attn_kernel(%arg0: i32, %arg1: i32, %arg2: i32, %arg3: memref<1x32x128xf32, #tpu.memory_space<vmem>>, %arg4: memref<1x8x128xbf16, #tpu.memory_space<vmem>>, %arg5: memref<1x8x128xbf16, #tpu.memory_space<vmem>>, %arg6: memref<1x40x128xbf16, #tpu.memory_space<vmem>>, %arg7: memref<1x1xf32, #tpu.memory_space<smem>>, %arg8: memref<1x32x128xf32, #tpu.memory_space<vmem>>, %arg9: memref<1x128xf32, #tpu.memory_space<vmem>>, %arg10: memref<40x128xf32, #tpu.memory_space<vmem>>) attributes {dimension_semantics = [#tpu.dimension_semantics<parallel>, #tpu.dimension_semantics<parallel>, #tpu.dimension_semantics<arbitrary>], iteration_bounds = array<i64: 2, 2, 2>, scalar_prefetch = 0 : i64, scratch_operands = 2 : i64, tpu.core_type = #tpu.core_type<tc>, window_params = [{transform_indices = @transform_0, window_bounds = array<i64: 1, 32, 128>}, {transform_indices = @transform_1, window_bounds = array<i64: 1, 8, 128>}, {transform_indices = @transform_2, window_bounds = array<i64: 1, 8, 128>}, {transform_indices = @transform_3, window_bounds = array<i64: 1, 40, 128>}, {transform_indices = @transform_4, window_bounds = array<i64: 1, 1>}, {transform_indices = @transform_5, window_bounds = array<i64: 1, 32, 128>}]} {
    %c0_i32 = arith.constant 0 : i32
    %0 = arith.cmpi eq, %arg2, %c0_i32 : i32
    %1 = arith.extui %0 : i1 to i32
    %c0_i32_0 = arith.constant 0 : i32
    %2 = arith.cmpi ne, %1, %c0_i32_0 : i32
    scf.if %2 {
      %cst_20 = arith.constant 0xFF800000 : f32
      %30 = vector.broadcast %cst_20 : f32 to vector<1x128xf32>
      %c0_21 = arith.constant 0 : index
      %c0_22 = arith.constant 0 : index
      %31 = vector.load %arg9[%c0_21, %c0_22] : memref<1x128xf32, #tpu.memory_space<vmem>>, vector<1x128xf32>
      tpu.vector_store %arg9[%c0_21, %c0_22], %30 {strides = array<i32>} : memref<1x128xf32, #tpu.memory_space<vmem>>, vector<1x128xf32>,
      %cst_23 = arith.constant 0.000000e+00 : f32
      %32 = vector.broadcast %cst_23 : f32 to vector<40x128xf32>
      %c0_24 = arith.constant 0 : index
      %c0_25 = arith.constant 0 : index
      %33 = vector.load %arg10[%c0_24, %c0_25] : memref<40x128xf32, #tpu.memory_space<vmem>>, vector<40x128xf32>
      tpu.vector_store %arg10[%c0_24, %c0_25], %32 {strides = array<i32>} : memref<40x128xf32, #tpu.memory_space<vmem>>, vector<40x128xf32>,
    } else {
    }
    %c0 = arith.constant 0 : index
    %c0_1 = arith.constant 0 : index
    %c0_2 = arith.constant 0 : index
    %3 = vector.load %arg5[%c0, %c0_1, %c0_2] : memref<1x8x128xbf16, #tpu.memory_space<vmem>>, vector<1x8x128xbf16>
    %4 = vector.shape_cast %3 : vector<1x8x128xbf16> to vector<8x128xbf16>
    %c0_3 = arith.constant 0 : index
    %c0_4 = arith.constant 0 : index
    %c0_5 = arith.constant 0 : index
    %5 = vector.load %arg4[%c0_3, %c0_4, %c0_5] : memref<1x8x128xbf16, #tpu.memory_space<vmem>>, vector<1x8x128xbf16>
    %6 = vector.shape_cast %5 : vector<1x8x128xbf16> to vector<8x128xbf16>
    %cst = arith.constant dense<0.000000e+00> : vector<128x128xf32>
    %7 = tpu.matmul %4, %6, %cst {dimension_numbers = #tpu.dot_dimension_numbers<[0], [0], [1], [1], [0, 1, 1, 1], [], []>} : vector<8x128xbf16>, vector<8x128xbf16>, vector<128x128xf32> -> vector<128x128xf32>
    %c0_6 = arith.constant 0 : index
    %c0_7 = arith.constant 0 : index
    %8 = vector.load %arg9[%c0_6, %c0_7] : memref<1x128xf32, #tpu.memory_space<vmem>>, vector<1x128xf32>
    %cst_8 = arith.constant dense<0xFF800000> : vector<128xf32>
    %9 = vector.multi_reduction <maximumf>, %7, %cst_8 [0] : vector<128x128xf32> to vector<128xf32>
    %10 = vector.shape_cast %9 : vector<128xf32> to vector<1x128xf32>
    %11 = arith.maximumf %8, %10 : vector<1x128xf32>
    %12 = arith.subf %8, %11 : vector<1x128xf32>
    %13 = math.exp %12 : vector<1x128xf32>
    %14 = vector.broadcast %11 : vector<1x128xf32> to vector<128x128xf32>
    %15 = arith.subf %7, %14 : vector<128x128xf32>
    %16 = math.exp %15 : vector<128x128xf32>
    %c0_9 = arith.constant 0 : index
    %c0_10 = arith.constant 0 : index
    %17 = vector.load %arg10[%c0_9, %c0_10] : memref<40x128xf32, #tpu.memory_space<vmem>>, vector<40x128xf32>
    %18 = vector.broadcast %13 : vector<1x128xf32> to vector<40x128xf32>
    %19 = arith.mulf %18, %17 : vector<40x128xf32>
    %c0_11 = arith.constant 0 : index
    %c0_12 = arith.constant 0 : index
    %c0_13 = arith.constant 0 : index
    %20 = vector.load %arg6[%c0_11, %c0_12, %c0_13] : memref<1x40x128xbf16, #tpu.memory_space<vmem>>, vector<1x40x128xbf16>
    %21 = vector.shape_cast %20 : vector<1x40x128xbf16> to vector<40x128xbf16>
    %22 = arith.truncf %16 : vector<128x128xf32> to vector<128x128xbf16>
    %cst_14 = arith.constant dense<0.000000e+00> : vector<40x128xf32>
    %23 = tpu.matmul %21, %22, %cst_14 {dimension_numbers = #tpu.dot_dimension_numbers<[1], [0], [0], [1], [0, 0, 1, 1], [], []>} : vector<40x128xbf16>, vector<128x128xbf16>, vector<40x128xf32> -> vector<40x128xf32>
    %24 = arith.addf %19, %23 : vector<40x128xf32>
    %c0_15 = arith.constant 0 : index
    %c0_16 = arith.constant 0 : index
    %25 = vector.load %arg10[%c0_15, %c0_16] : memref<40x128xf32, #tpu.memory_space<vmem>>, vector<40x128xf32>
    tpu.vector_store %arg10[%c0_15, %c0_16], %24 {strides = array<i32>} : memref<40x128xf32, #tpu.memory_space<vmem>>, vector<40x128xf32>,
    %c0_17 = arith.constant 0 : index
    %c0_18 = arith.constant 0 : index
    %26 = vector.load %arg9[%c0_17, %c0_18] : memref<1x128xf32, #tpu.memory_space<vmem>>, vector<1x128xf32>
    tpu.vector_store %arg9[%c0_17, %c0_18], %11 {strides = array<i32>} : memref<1x128xf32, #tpu.memory_space<vmem>>, vector<1x128xf32>,
    %c1_i32 = arith.constant 1 : i32
    %27 = arith.cmpi eq, %arg2, %c1_i32 : i32
    %28 = arith.extui %27 : i1 to i32
    %c0_i32_19 = arith.constant 0 : i32
    %29 = arith.cmpi ne, %28, %c0_i32_19 : i32
    scf.if %29 {
      %c32 = arith.constant 32 : index
      %c0_20 = arith.constant 0 : index
      %30 = vector.load %arg10[%c32, %c0_20] : memref<40x128xf32, #tpu.memory_space<vmem>>, vector<1x128xf32>
      %cst_21 = arith.constant 1.000000e+00 : f32
      %31 = vector.broadcast %cst_21 : f32 to vector<1x128xf32>
      %32 = arith.divf %31, %30 : vector<1x128xf32>
      %c0_22 = arith.constant 0 : index
      %c0_23 = arith.constant 0 : index
      %33 = memref.load %arg7[%c0_22, %c0_23] : memref<1x1xf32, #tpu.memory_space<smem>>
      %c0_24 = arith.constant 0 : index
      %c0_25 = arith.constant 0 : index
      %34 = vector.load %arg10[%c0_24, %c0_25] : memref<40x128xf32, #tpu.memory_space<vmem>>, vector<32x128xf32>
      %35 = vector.broadcast %32 : vector<1x128xf32> to vector<32x128xf32>
      %36 = arith.mulf %34, %35 : vector<32x128xf32>
      %37 = vector.broadcast %33 : f32 to vector<32x128xf32>
      %38 = arith.mulf %37, %36 : vector<32x128xf32>
      %c0_26 = arith.constant 0 : index
      %c0_27 = arith.constant 0 : index
      %c0_28 = arith.constant 0 : index
      %39 = vector.load %arg3[%c0_26, %c0_27, %c0_28] : memref<1x32x128xf32, #tpu.memory_space<vmem>>, vector<1x32x128xf32>
      %40 = vector.shape_cast %39 : vector<1x32x128xf32> to vector<32x128xf32>
      %41 = arith.addf %38, %40 : vector<32x128xf32>
      %c0_29 = arith.constant 0 : index
      %c0_30 = arith.constant 0 : index
      %c0_31 = arith.constant 0 : index
      %42 = vector.load %arg8[%c0_29, %c0_30, %c0_31] : memref<1x32x128xf32, #tpu.memory_space<vmem>>, vector<1x32x128xf32>
      %43 = vector.shape_cast %42 : vector<1x32x128xf32> to vector<32x128xf32>
      %44 = vector.shape_cast %41 : vector<32x128xf32> to vector<1x32x128xf32>
      tpu.vector_store %arg8[%c0_29, %c0_30, %c0_31], %44 {strides = array<i32>} : memref<1x32x128xf32, #tpu.memory_space<vmem>>, vector<1x32x128xf32>,
    } else {
    }
    return
  }
  func.func @transform_0(%arg0: i32, %arg1: i32, %arg2: i32) -> (i32, i32, i32) {
    %c0_i32 = arith.constant 0 : i32
    %c0_i32_0 = arith.constant 0 : i32
    return %arg0, %c0_i32, %arg1 : i32, i32, i32
  }
  func.func @transform_1(%arg0: i32, %arg1: i32, %arg2: i32) -> (i32, i32, i32) {
    %c0_i32 = arith.constant 0 : i32
    %c0_i32_0 = arith.constant 0 : i32
    return %arg0, %c0_i32, %arg1 : i32, i32, i32
  }
  func.func @transform_2(%arg0: i32, %arg1: i32, %arg2: i32) -> (i32, i32, i32) {
    %c0_i32 = arith.constant 0 : i32
    %c0_i32_0 = arith.constant 0 : i32
    return %arg0, %c0_i32, %arg2 : i32, i32, i32
  }
  func.func @transform_3(%arg0: i32, %arg1: i32, %arg2: i32) -> (i32, i32, i32) {
    %c0_i32 = arith.constant 0 : i32
    %c0_i32_0 = arith.constant 0 : i32
    return %arg0, %c0_i32, %arg2 : i32, i32, i32
  }
  func.func @transform_4(%arg0: i32, %arg1: i32, %arg2: i32) -> (i32, i32) {
    %c0_i32 = arith.constant 0 : i32
    %c0_i32_0 = arith.constant 0 : i32
    %c0_i32_1 = arith.constant 0 : i32
    return %c0_i32, %c0_i32_0 : i32, i32
  }
  func.func @transform_5(%arg0: i32, %arg1: i32, %arg2: i32) -> (i32, i32, i32) {
    %c0_i32 = arith.constant 0 : i32
    %c0_i32_0 = arith.constant 0 : i32
    return %arg0, %c0_i32, %arg1 : i32, i32, i32
  }
}

</mosaic_0001>

<bundles_post_ra>
// kernel: change_guide_module.3
= control target key start
LH: loop header
LB: loop body
LE: loop exit
PB: predicated region body
PF: predicated region fallthrough
CT: control target
= control target key end

     0   :  { %s1657_s0 = inlined_call_operand.vmem [shape: f32[2,32,256], index: 0, kind: input, shape index: {}]   ;;  %s1658_s1 = inlined_call_operand.vmem [shape: bf16[2,8,256], index: 1, kind: input, shape index: {}]   ;;  %s1659_s2 = inlined_call_operand.vmem [shape: bf16[2,8,256], index: 2, kind: input, shape index: {}]   ;;  %s1660_s3 = inlined_call_operand.vmem [shape: bf16[2,40,256], index: 3, kind: input, shape index: {}]   ;;  %s1661_s4 = inlined_call_operand.<no memory space> [shape: f32[1,1], index: 4, kind: input, shape index: {}]   ;;  %s1662_s5 = inlined_call_operand.vmem [shape: f32[2,32,256], index: 5, kind: output, shape index: {}]  }
   0x1   :  { %1669 = sst [smem:[#allocation14_spill]] %s1657_s0 }
   0x2   :  { %1670 = sst [smem:[#allocation15_spill]] %s1660_s3 }
   0x3   :  { %10 = sst [smem:[#allocation4]] %s1661_s4 }
   0x4   :  { %s1383_s20 = smov 0   ;;  %s1385_s21 = smov 0  }
   0x5   :  { %s1387_s22 = smov 0   ;;  %s1389_s23 = smov 0  }
   0x6   :  { %s1391_s24 = smov 0   ;;  %s1393_s25 = smov 0  }
   0x7   :  { %s1395_s26 = smov 0   ;;  %s1397_s27 = smov 0  }
   0x8   :  { %s1399_s28 = smov 0   ;;  %s1401_s29 = smov 0  }
   0x9   :  { %s1403_s4 = smov 0  }
   0xa LB: > { %1671 = sst [smem:[#allocation8_spill]] %s1332_s27  ;;  %s28_s30 = sadd.s32 1, %s1332_s27  ;;  %s1344_s4 = sphi %s1403_s4, %s16_s4   ;;  %s1340_s29 = sphi %s1401_s29, %s1687_s29   ;;  %s1336_s28 = sphi %s1399_s28, %s1686_s28   ;;  %s1332_s27 = sphi %s1397_s27, %s1685_s27   ;;  %s1328_s26 = sphi %s1395_s26, %s1684_s26   ;;  %s1324_s25 = sphi %s1393_s25, %s1683_s25   ;;  %s1320_s24 = sphi %s1391_s24, %s1682_s24   ;;  %s1316_s23 = sphi %s1389_s23, %s1691_s23   ;;  %s1312_s22 = sphi %s1387_s22, %s1690_s22   ;;  %s1308_s21 = sphi %s1385_s21, %s1689_s21   ;;  %s1304_s20 = sphi %s1383_s20, %s1688_s20  }
   0xb   : > { %1672 = sst [smem:[#allocation9_spill]] %s1336_s28  ;;  %p29_p0 = scmp.ge.s32.totalorder %s28_s30, 2 }
   0xc   : > { %1673 = sst [smem:[#allocation10_spill]] %s1340_s29  ;;  %s31_s6 = sadd.s32 1, %s1336_s28 }
   0xd   : > { %s1693_s30 = smov (%p29_p0, %s28_s30), 0  ;;  %s1695_s6 = smov (!%p29_p0, %s31_s6), %s1336_s28 }
   0xe   : > { %1674 = sst [smem:[#allocation11_spill]] %s1693_s30  ;;  %p51_p1 = scmp.ne.s32.totalorder %s1316_s23, %s1312_s22 }
   0xf   : > { %p52_p2 = scmp.eq.s32.totalorder %s1344_s4, 0  ;;  %p33_p3 = scmp.ge.s32.totalorder %s1695_s6, 2 }
  0x10   : > { %s35_s7 = sadd.s32 1, %s1340_s29  ;;  %s1007_s8 = sadd.s32 4294967295, %s1344_s4  }
  0x11   : > { %p1451_p4 = por %p52_p2, %p51_p1  ;;  %s1697_s6 = smov (%p33_p3, %s1695_s6), 0 }
  0x12   : > { %1676 = sst [smem:[#allocation12_spill]] %s1697_s6  ;;  %s1699_s7 = smov (!%p33_p3, %s35_s7), %s1340_s29 }
  0x13   : > { %s124_s10 = ssub.s32 %s1332_s27, %s1693_s30  ;;  %p135_p5 = scmp.ne.s32.totalorder %s1308_s21, %s1304_s20 }
  0x14   : > { %p37_p6 = scmp.ge.s32.totalorder %s1699_s7, 2  ;;  %p188_p7 = scmp.eq.s32.totalorder %s1007_s8, 7 }
  0x15   : > { %s40_s11 = ssub.s32 %s1336_s28, %s1697_s6  ;;  %p1464_p8 = por %p135_p5, %p52_p2 }
  0x16   : > { %s1701_s7 = smov (%p37_p6, %s1699_s7), 0  ;;  %s44_s13 = sadd.s32 1, %s1316_s23 }
  0x17   : > { %1678 = sst [smem:[#allocation13_spill]] %s1701_s7  ;;  %p1474_p9 = por %p188_p7, %p51_p1 }
  0x18   : > { %s39_s15 = ssub.s32 %s1340_s29, %s1701_s7  ;;  %s128_s16 = sadd.s32 1, %s1308_s21 }
  0x19   : > { %s41_s17 = sor.u32 %s40_s11, %s39_s15  ;;  %s125_s18 = sor.u32 %s124_s10, %s39_s15 }
  0x1a   : > { %p42_p10 = scmp.eq.s32.totalorder %s41_s17, 0  ;;  %p126_p11 = scmp.eq.s32.totalorder %s125_s18, 0 }
  0x1b   : > { %p1010_p12 = scmp.ge.s32.totalorder %s1344_s4, 8 }
  0x1c   : > { %s1482_s19 = scalar_select %p42_p10, %s1316_s23, %s44_s13  }
  0x1d   : > { %s1485_s8 = scalar_select %p126_p11, %s1308_s21, %s128_s16  }
  0x1e   : > { %213 = sbr.rel (%p1010_p12) target bundleno = 61 (0x3d), region = 20 }
  0x25   : > { %216 = sbr.rel (!%p1451_p4) target bundleno = 49 (0x31), region = 24  ;;  %s218_s6 = sand.u32 (%p1451_p4), 1, %s1316_s23  }
  0x26   : > { %s1012_s7 = sshll.u32 (%p1451_p4), %s1340_s29, 3  ;;  %s1011_s30 = sshll.u32 (%p1451_p4), %s218_s6, 5 }
  0x27   : > { %s222_s11 = sadd.s32 (%p1451_p4), %s1336_s28, %s1012_s7  ;;  %s1680_s0 = sld [smem:[#allocation14_spill]] (%p1451_p4) }
  0x28   : > { %s1013_s10 = sshll.u32 (%p1451_p4), %s222_s11, 3  ;;  %s220_s16 = scalar_lea.vmem (%p1451_p4), [#allocation5], %s1011_s30 }
  0x2d   : > { %s224_s13 = scalar_lea.vmem %s1680_s0, %s1013_s10 }
  0x2e   : > { %v258_v0 = vld [vmem:[%s224_s13] sm:$0xff]  ;;  %v260_v1 = vld [vmem:[%s224_s13 + $0x10] sm:$0xff] }
  0x2f   : > { %v262_v2 = vld [vmem:[%s224_s13 + $0x20] sm:$0xff]  ;;  %259 = vst [vmem:[%s220_s16] sm:$0xff] %v258_v0  ;;  %261 = vst [vmem:[%s220_s16 + $0x8] sm:$0xff] %v260_v1  ;;  %v264_v3 = vld [vmem:[%s224_s13 + $0x30] sm:$0xff] }
  0x30   : > { %263 = vst [vmem:[%s220_s16 + $0x10] sm:$0xff] %v262_v2  ;;  %265 = vst [vmem:[%s220_s16 + $0x18] sm:$0xff] %v264_v3 }
  0x31 PF: > { %293 = sbr.rel (!%p1464_p8) target bundleno = 61 (0x3d), region = 70  ;;  %s295_s6 = sand.u32 (%p1464_p8), 1, %s1308_s21  }
  0x32   : > { %s1124_s7 = smul.u32 (%p1464_p8), 10, %s1340_s29  ;;  %s1681_s3 = sld [smem:[#allocation15_spill]] (%p1464_p8) }
  0x33   : > { %s1123_s9 = smul.u32 (%p1464_p8), 20, %s295_s6 }
  0x34   : > { %s299_s18 = sadd.s32 (%p1464_p8), %s1332_s27, %s1124_s7 }
  0x35   : > { %s1014_s11 = sshll.u32 (%p1464_p8), %s299_s18, 2  ;;  %s297_s17 = scalar_lea.vmem (%p1464_p8), [#allocation6], %s1123_s9 }
  0x38   : > { %s301_s30 = scalar_lea.vmem %s1681_s3, %s1014_s11 }
  0x39   : > { %v317_v4 = vld [vmem:[%s301_s30] sm:$0xf]  ;;  %v319_v5 = vld [vmem:[%s301_s30 + $0x8] sm:$0xf]  ;;  %v321_v6 = vld [vmem:[%s301_s30 + $0x10] sm:$0xf] }
  0x3a   : > { %318 = vst [vmem:[%s297_s17] sm:$0xf] %v317_v4  ;;  %320 = vst [vmem:[%s297_s17 + $0x4] sm:$0xf] %v319_v5  ;;  %v323_v7 = vld [vmem:[%s301_s30 + $0x18] sm:$0xf] }
  0x3b   : > { %322 = vst [vmem:[%s297_s17 + $0x8] sm:$0xf] %v321_v6  ;;  %v325_v8 = vld [vmem:[%s301_s30 + $0x20] sm:$0xf]  ;;  %324 = vst [vmem:[%s297_s17 + $0xc] sm:$0xf] %v323_v7 }
  0x3c   : > { %326 = vst [vmem:[%s297_s17 + $0x10] sm:$0xf] %v325_v8 }
  0x3d PF: > { %p1015_p13 = scmp.ge.s32.totalorder %s1344_s4, 1  ;;  %p358_p0 = scmp.lt.s32.totalorder %s1344_s4, 9 }
  0x3f   : > { %p359_p1 = pnand %p1015_p13, %p358_p0 }
  0x40   : > { %s365_s12 = sand.u32 (!%p359_p1), 1, %s1312_s22   ;;  %s372_s13 = sand.u32 (!%p359_p1), 1, %s1304_s20  }
  0x41   : > { %362 = sbr.rel (%p359_p1) target bundleno = 761 (0x2f9), region = 111  ;;  %s1016_s16 = sshll.u32 (!%p359_p1), %s365_s12, 5 }
  0x42   : > { %s1125_s6 = smul.u32 (!%p359_p1), 20, %s372_s13  ;;  %p418_p2 = scmp.lt.s32.totalorder (!%p359_p1), %s1328_s26, 1 }
  0x43   : > { %p420_p3 = scmp.lt.s32.totalorder (!%p359_p1), %s1324_s25, 1  ;;  %p428_p4 = scmp.lt.s32.totalorder (!%p359_p1), %s1320_s24, 1 }
  0x44   : > { %s1520_s12 = scalar_lea.vmem (!%p359_p1), [#allocation5], %s1016_s16  ;;  %s1522_s13 = scalar_lea.vmem (!%p359_p1), [#allocation6], %s1125_s6 }
  0x45   : > { %s1524_s27 = scalar_lea.vmem (!%p359_p1), [#allocation7], %s1016_s16  ;;  %p1022_p5 = scmp.ne.s32.totalorder (!%p359_p1), %s1320_s24, 0 }
  0x48   : > { %s419_s7 = scalar_select %p418_p2, %s1328_s26, 1 }
  0x49   : > { %s421_s9 = scalar_select %p420_p3, %s1324_s25, 1 }
  0x4a   : > { %s1018_s18 = sshll.u32 %s419_s7, 1  ;;  %v1346_v9 = vmov (!%p1022_p5), -inf   ;;  %v1347_v10 = vmov (!%p1022_p5), 0.0  }
  0x4b   : > { %s423_s11 = sadd.s32 %s1018_s18, %s421_s9  ;;  %439 = vst [vmem:[#allocation2] sm:$0x1] (!%p1022_p5), %v1346_v9  ;;  %440 = vst [vmem:[#allocation3] sm:$0xff] (!%p1022_p5), %v1347_v10 }
  0x4c   : > { %s1019_s10 = sshll.u32 %s423_s11, 2  ;;  %438 = sbr.rel (%p1022_p5) target bundleno = 83 (0x53), region = 123  ;;  %441 = vst [vmem:[#allocation3 + $0x8] sm:$0xff] (!%p1022_p5), %v1347_v10  ;;  %442 = vst [vmem:[#allocation3 + $0x10] sm:$0xff] (!%p1022_p5), %v1347_v10 }
  0x4d   : > { %s425_s17 = scalar_lea.vmem %s1658_s1, %s1019_s10  ;;  %443 = vst [vmem:[#allocation3 + $0x18] sm:$0xff] (!%p1022_p5), %v1347_v10  ;;  %444 = vst [vmem:[#allocation3 + $0x20] sm:$0xff] (!%p1022_p5), %v1347_v10 }
  0x4e   : > { %s429_s0 = scalar_select %p428_p4, %s1320_s24, 1 }
  0x50   : > { %s431_s3 = sadd.s32 %s1018_s18, %s429_s0 }
  0x51   : > { %s1021_s29 = sshll.u32 %s431_s3, 2 }
  0x52   : > { %s433_s20 = scalar_lea.vmem %s1659_s2, %s1021_s29 }
  0x53 PF: > { %v445_v11 = vld [vmem:[%s433_s20] sm:$0xf]  ;;  %vm488_vm0 = vcmask 1043456   ;;  %vm463_vm1 = vcmask 64512   ;;  %v1348_v22 = vmov 0.0   ;;  %vm1349_vm2 = vmmov 0  }
  0x54   : > { %v446_v12 = vld [vmem:[%s425_s17] sm:$0xf]  ;;  %447 = vxpose.xlu0.c.b16.start.end [1/1] (short) %v445_v11, 128  ;;  %1106 = vmatprep.subr.bf16.mxu1 %v1348_v22  ;;  %v616_v56 = vlaneseq  ;;  %p1034_p6 = scmp.ne.s32.totalorder %s1320_s24, 1 }
  0x55   : > { %1122 = vmatprep.subr.msk.bf16.mxu0 %vm488_vm0, %v446_v12  ;;  %v490_v13 = vsel %vm488_vm0, %v446_v12, 0  ;;  %1098 = vmatprep.mubr.msk.bf16.mxu1 %vm1349_vm2, %v1348_v22  ;;  %v589_v61 = vld [vmem:[#allocation2] sm:$0x1]  ;;  %s788_s0 = sld [smem:[#allocation4]] (!%p1034_p6) }
  0x56   : > { %1061 = vmatpush3.bf16.msra.mxu0 %v490_v13  ;;  %v617_v59 = vshrl.u32 %v616_v56, 7 }
  0x57   : > { %1078 = vmatprep.subr.bf16.mxu0 %v1348_v22 }
  0x58   : > { %v1565_v63 = vsub.s32 0, %v617_v59 }
  0xba   : > { %v455_v14 = vpop.trf.xlu0 }
  0xbb   : > { %1062 = vmatprep.mubr.msk.bf16.mxu0 %vm463_vm1, %v455_v14 }
  0xbe   : > { %v456_v15 = vpop.trf.xlu0 }
  0xbf   : > { %1063 = vmatmul.mubr.msk.bf16.vlgmr.msra.gmra.mrb[0].mxu0 %vm463_vm1, %v456_v15 }
  0xc2   : > { %v457_v16 = vpop.trf.xlu0 }
  0xc3   : > { %1066 = vmatprep.mubr.msk.bf16.mxu0 %vm463_vm1, %v457_v16 }
  0xc6   : > { %v458_v17 = vpop.trf.xlu0 }
  0xc7   : > { %1067 = vmatmul.mubr.msk.bf16.gmra.mrb[4].mxu0 %vm463_vm1, %v458_v17 }
  0xca   : > { %v459_v18 = vpop.trf.xlu0 }
  0xcb   : > { %1070 = vmatprep.mubr.msk.bf16.mxu0 %vm463_vm1, %v459_v18 }
  0xce   : > { %v460_v19 = vpop.trf.xlu0 }
  0xcf   : > { %1071 = vmatmul.mubr.msk.bf16.gmra.mrb[8].mxu0 %vm463_vm1, %v460_v19 }
  0xd2   : > { %v461_v20 = vpop.trf.xlu0 }
  0xd3   : > { %1074 = vmatprep.mubr.msk.bf16.mxu0 %vm463_vm1, %v461_v20 }
  0xd6   : > { %v462_v21 = vpop.trf.xlu0 }
  0xd7   : > { %1075 = vmatmul.mubr.msk.bf16.gmra.mrb[12].mxu0 %vm463_vm1, %v462_v21 }
  0xd8   : > { %1094 = vmatprep.mubr.msk.bf16.mxu0 %vm1349_vm2, %v1348_v22 }
 0x192   : > { %v1064_v23 = vpop.f32.mrb[0].mxu0 }
 0x193   : > { %v526_v24 = vpop.f32.mrb[1].mxu0 }
 0x194   : > { %v1065_v25 = vpop.f32.mrb[2].mxu0 }
 0x195   : > { %v529_v26 = vpop.f32.mrb[3].mxu0 }
 0x19a   : > { %v1541_v27 = vpop.f32.mrb[4].mxu0 }
 0x19b   : > { %v592_v28 = vmax.f32 %v1064_v23, %v1541_v27  ;;  %v542_v29 = vpop.f32.mrb[5].mxu0 }
 0x19c   : > { %v590_v30 = vmax.f32 %v526_v24, %v542_v29  ;;  %v1544_v31 = vpop.f32.mrb[6].mxu0 }
 0x19d   : > { %v593_v32 = vmax.f32 %v1065_v25, %v1544_v31  ;;  %v545_v33 = vpop.f32.mrb[7].mxu0 }
 0x19e   : > { %v591_v34 = vmax.f32 %v529_v26, %v545_v33 }
 0x1a2   : > { %v1547_v35 = vpop.f32.mrb[8].mxu0 }
 0x1a3   : > { %v596_v36 = vmax.f32 %v592_v28, %v1547_v35  ;;  %v1550_v37 = vpop.f32.mrb[9].mxu0 }
 0x1a4   : > { %v594_v38 = vmax.f32 %v590_v30, %v1550_v37  ;;  %v1553_v39 = vpop.f32.mrb[10].mxu0 }
 0x1a5   : > { %v597_v40 = vmax.f32 %v593_v32, %v1553_v39  ;;  %v561_v41 = vpop.f32.mrb[11].mxu0 }
 0x1a6   : > { %v595_v42 = vmax.f32 %v591_v34, %v561_v41 }
 0x1aa   : > { %v1556_v43 = vpop.f32.mrb[12].mxu0 }
 0x1ab   : > { %v600_v44 = vmax.f32 %v596_v36, %v1556_v43  ;;  %v1559_v45 = vpop.f32.mrb[13].mxu0 }
 0x1ac   : > { %v598_v46 = vmax.f32 %v594_v38, %v1559_v45  ;;  %v1562_v47 = vpop.f32.mrb[14].mxu0 }
 0x1ad   : > { %v601_v48 = vmax.f32 %v597_v40, %v1562_v47  ;;  %v577_v49 = vpop.f32.mrb[15].mxu0 }
 0x1ae   : > { %v599_v50 = vmax.f32 %v595_v42, %v577_v49 }
 0x1af   : > { %v603_v51 = vmax.f32 %v600_v44, %v601_v48 }
 0x1b0   : > { %v602_v52 = vmax.f32 %v598_v46, %v599_v50 }
 0x1b2   : > { %v604_v53 = vmax.f32 %v602_v52, %v603_v51 }
 0x1b4   : > { %v605_v54 = vrot.slane %v604_v53, 4 }
 0x1b6   : > { %v606_v55 = vmax.f32 %v604_v53, %v605_v54 }
 0x1b8   : > { %v607_v57 = vrot.slane %v606_v55, 2 }
 0x1ba   : > { %v608_v58 = vmax.f32 %v606_v55, %v607_v57 }
 0x1bc   : > { %v609_v60 = vrot.slane %v608_v58, 1 }
 0x1be   : > { %v610_v62 = vmax.f32 %v608_v58, %v609_v60 }
 0x1c0   : > { %v611_v0 = vmax.f32 %v589_v61, %v610_v62 }
 0x1c2   : > { %v612_v1 = vsub.f32 %v589_v61, %v611_v0  ;;  %v619_v2 = vrot.slane %v611_v0, %v1565_v63  ;;  %780 = vst [vmem:[#allocation2] sm:$0x1] %v611_v0  ;;  %v1219_v0 = vld [vmem:[%s1522_s13] sm:$0xff]  }
 0x1c4   : > { %v613_v3 = vmul.f32 1.442695, %v612_v1  ;;  %v634_v4 = vsub.f32 %v577_v49, %v619_v2  ;;  %v621_v5 = vsub.f32 %v526_v24, %v619_v2  ;;  %v622_v6 = vsub.f32 %v529_v26, %v619_v2  ;;  %v1220_v1 = vld [vmem:[%s1522_s13 + $0x8] sm:$0xff]  }
 0x1c5   : > { %v623_v7 = vsub.f32 %v1064_v23, %v619_v2  ;;  %v624_v8 = vsub.f32 %v1065_v25, %v619_v2  ;;  %v625_v9 = vsub.f32 %v542_v29, %v619_v2  ;;  %v626_v10 = vsub.f32 %v545_v33, %v619_v2 }
 0x1c6   : > { %1222 = vpow2.f32 %v613_v3  ;;  %v663_v11 = vmul.f32 1.442695, %v634_v4  ;;  %v637_v12 = vmul.f32 1.442695, %v621_v5  ;;  %v639_v13 = vmul.f32 1.442695, %v622_v6 }
 0x1c7   : > { %v641_v14 = vmul.f32 1.442695, %v623_v7  ;;  %v627_v15 = vsub.f32 %v1541_v27, %v619_v2  ;;  %v643_v16 = vmul.f32 1.442695, %v624_v8  ;;  %v628_v17 = vsub.f32 %v1544_v31, %v619_v2  ;;  %v669_v3 = vld [vmem:[#allocation3] sm:$0xff]  ;;  %v671_v4 = vld [vmem:[#allocation3 + $0x10] sm:$0xff] }
 0x1c8   : > { %1224 = vpow2.f32 %v663_v11  ;;  %v629_v18 = vsub.f32 %v1550_v37, %v619_v2  ;;  %v645_v19 = vmul.f32 1.442695, %v625_v9  ;;  %v630_v20 = vsub.f32 %v561_v41, %v619_v2  ;;  %v670_v5 = vld [vmem:[#allocation3 + $0x8] sm:$0xff]  ;;  %v672_v6 = vld [vmem:[#allocation3 + $0x18] sm:$0xff] }
 0x1c9   : > { %1226 = vpow2.f32 %v637_v12  ;;  %v631_v21 = vsub.f32 %v1547_v35, %v619_v2  ;;  %v647_v23 = vmul.f32 1.442695, %v626_v10  ;;  %v632_v24 = vsub.f32 %v1553_v39, %v619_v2 }
 0x1ca   : > { %1228 = vpow2.f32 %v639_v13  ;;  %v649_v25 = vmul.f32 1.442695, %v627_v15  ;;  %v633_v26 = vsub.f32 %v1559_v45, %v619_v2  ;;  %v651_v27 = vmul.f32 1.442695, %v628_v17 }
 0x1cb   : > { %1230 = vpow2.f32 %v641_v14  ;;  %v635_v28 = vsub.f32 %v1556_v43, %v619_v2  ;;  %v636_v29 = vsub.f32 %v1562_v47, %v619_v2  ;;  %v653_v30 = vmul.f32 1.442695, %v629_v18  ;;  %v1221_v2 = vld [vmem:[%s1522_s13 + $0x10] ss:$0 sps:$4 sm:$0xff]  }
 0x1cc   : > { %1232 = vpow2.f32 %v643_v16  ;;  %v655_v31 = vmul.f32 1.442695, %v630_v20  ;;  %v657_v32 = vmul.f32 1.442695, %v631_v21  ;;  %v659_v34 = vmul.f32 1.442695, %v632_v24 }
 0x1cd   : > { %1234 = vpow2.f32 %v645_v19  ;;  %v661_v35 = vmul.f32 1.442695, %v633_v26  ;;  %v665_v38 = vmul.f32 1.442695, %v635_v28  ;;  %v667_v40 = vmul.f32 1.442695, %v636_v29 }
 0x1ce   : > { %1236 = vpow2.f32 %v647_v23  ;;  %v673_v23 = vld [vmem:[#allocation3 + $0x20] sm:$0xff] }
 0x1cf   : > { %1238 = vpow2.f32 %v649_v25 }
 0x1d0   : > { %v1223_v33 = vpop.eup %1222  ;;  %1240 = vpow2.f32 %v651_v27 }
 0x1d1   : > { %1242 = vpow2.f32 %v653_v30  ;;  %v1577_v36 = vrot.slane %v1223_v33, %v1565_v63 }
 0x1d2   : > { %v1225_v37 = vpop.eup %1224  ;;  %1244 = vpow2.f32 %v655_v31 }
 0x1d3   : > { %v1227_v39 = vpop.eup %1226  ;;  %1246 = vpow2.f32 %v657_v32  ;;  %v680_v7 = vmul.f32 %v1577_v36, %v669_v3  ;;  %v682_v8 = vmul.f32 %v1577_v36, %v671_v4  ;;  %v681_v15 = vmul.f32 %v1577_v36, %v670_v5 }
 0x1d4   : > { %v1229_v41 = vpop.eup %1228  ;;  %1248 = vpow2.f32 %v659_v34  ;;  %v684_v24 = vmul.f32 %v1577_v36, %v673_v23 }
 0x1d5   : > { %v1231_v42 = vpop.eup %1230  ;;  %v690_v43 = vpack.c.bf16 %v1229_v41, %v1227_v39  ;;  %1250 = vpow2.f32 %v661_v35  ;;  %v806_v39 = vld [vmem:[%s1520_s12] sm:$0xff] (!%p1034_p6) }
 0x1d6   : > { %v1233_v44 = vpop.eup %1232  ;;  %1252 = vpow2.f32 %v665_v38 }
 0x1d7   : > { %v1235_v45 = vpop.eup %1234  ;;  %1079 = vmatpush3.bf16.msra.mxu0 %v690_v43  ;;  %1114 = vmatpush3.bf16.msra.mxu1 %v690_v43  ;;  %v691_v46 = vpack.c.bf16 %v1233_v44, %v1231_v42  ;;  %1254 = vpow2.f32 %v667_v40  ;;  %v807_v43 = vld [vmem:[%s1520_s12 + $0x8] sm:$0xff] (!%p1034_p6)  ;;  %v808_v44 = vld [vmem:[%s1520_s12 + $0x10] sm:$0xff] (!%p1034_p6) }
 0x1d8   : > { %v1237_v47 = vpop.eup %1236  ;;  %1080 = vmatprep.subr.bf16.mxu0 %v1348_v22  ;;  %1107 = vmatprep.subr.bf16.mxu1 %v1348_v22 }
 0x1d9   : > { %v1239_v48 = vpop.eup %1238  ;;  %v692_v49 = vpack.c.bf16 %v1237_v47, %v1235_v45  ;;  %v809_v45 = vld [vmem:[%s1520_s12 + $0x18] sm:$0xff] (!%p1034_p6) }
 0x1da   : > { %v1241_v50 = vpop.eup %1240 }
 0x1db   : > { %v1243_v51 = vpop.eup %1242  ;;  %1081 = vmatpush3.bf16.msra.mxu0 %v691_v46  ;;  %1115 = vmatpush3.bf16.msra.mxu1 %v691_v46  ;;  %v693_v52 = vpack.c.bf16 %v1241_v50, %v1239_v48 }
 0x1dc   : > { %v1245_v53 = vpop.eup %1244  ;;  %1082 = vmatprep.subr.bf16.mxu0 %v1348_v22  ;;  %1108 = vmatprep.subr.bf16.mxu1 %v1348_v22 }
 0x1dd   : > { %v1247_v54 = vpop.eup %1246  ;;  %v694_v55 = vpack.c.bf16 %v1245_v53, %v1243_v51 }
 0x1de   : > { %v1249_v56 = vpop.eup %1248 }
 0x1df   : > { %v1251_v57 = vpop.eup %1250  ;;  %1083 = vmatpush3.bf16.msra.mxu0 %v692_v49  ;;  %1116 = vmatpush3.bf16.msra.mxu1 %v692_v49  ;;  %v695_v58 = vpack.c.bf16 %v1249_v56, %v1247_v54 }
 0x1e0   : > { %v1253_v59 = vpop.eup %1252  ;;  %1084 = vmatprep.subr.bf16.mxu0 %v1348_v22  ;;  %1109 = vmatprep.subr.bf16.mxu1 %v1348_v22  ;;  %v696_v60 = vpack.c.bf16 %v1225_v37, %v1251_v57  ;;  %v801_v37 = vstv (!%p1034_p6), %s788_s0 }
 0x1e1   : > { %v1255_v61 = vpop.eup %1254 }
 0x1e2   : > { %v697_v62 = vpack.c.bf16 %v1255_v61, %v1253_v59 }
 0x1e3   : > { %1085 = vmatpush3.bf16.msra.mxu0 %v693_v52  ;;  %1117 = vmatpush3.bf16.msra.mxu1 %v693_v52 }
 0x1e4   : > { %1086 = vmatprep.subr.bf16.mxu0 %v1348_v22  ;;  %1110 = vmatprep.subr.bf16.mxu1 %v1348_v22 }
 0x1e7   : > { %1087 = vmatpush3.bf16.msra.mxu0 %v694_v55  ;;  %1118 = vmatpush3.bf16.msra.mxu1 %v694_v55 }
 0x1e8   : > { %1088 = vmatprep.subr.bf16.mxu0 %v1348_v22  ;;  %1111 = vmatprep.subr.bf16.mxu1 %v1348_v22 }
 0x1eb   : > { %1089 = vmatpush3.bf16.msra.mxu0 %v695_v58  ;;  %1119 = vmatpush3.bf16.msra.mxu1 %v695_v58 }
 0x1ec   : > { %1090 = vmatprep.subr.bf16.mxu0 %v1348_v22  ;;  %1112 = vmatprep.subr.bf16.mxu1 %v1348_v22 }
 0x1ef   : > { %1091 = vmatpush3.bf16.msra.mxu0 %v696_v60  ;;  %1120 = vmatpush3.bf16.msra.mxu1 %v696_v60 }
 0x1f0   : > { %1092 = vmatprep.subr.bf16.mxu0 %v1348_v22  ;;  %1113 = vmatprep.subr.bf16.mxu1 %v1348_v22 }
 0x1f3   : > { %1093 = vmatpush3.bf16.msra.mxu0 %v697_v62  ;;  %1121 = vmatpush3.bf16.msra.mxu1 %v697_v62 }
 0x1f6   : > { %1095 = vmatmul.mubr.bf16.vlgmr.msra.gmra.mrb[16].mxu0 %v1219_v0  ;;  %1099 = vmatmul.mubr.bf16.vlgmr.msra.gmra.mrb[0].mxu1 %v1220_v1 }
 0x1f7   : > { %1102 = vmatprep.mubr.msk.bf16.mxu1 %vm1349_vm2, %v1348_v22  ;;  %v683_v22 = vmul.f32 %v1577_v36, %v672_v6 }
 0x1fe   : > { %1103 = vmatmul.mubr.bf16.gmra.mrb[4].mxu1 %v1221_v2 }
 0x2c9   : > { %v748_v9 = vpop.f32.mrb[16].mxu0  ;;  %v756_v10 = vpop.f32.mrb[0].mxu1 }
 0x2ca   : > { %v770_v11 = vadd.f32 %v748_v9, %v680_v7  ;;  %v772_v12 = vadd.f32 %v756_v10, %v682_v8  ;;  %v1096_v13 = vpop.f32.mrb[17].mxu0  ;;  %v1100_v14 = vpop.f32.mrb[1].mxu1 }
 0x2cb   : > { %v751_v16 = vpop.f32.mrb[18].mxu0  ;;  %v759_v17 = vpop.f32.mrb[2].mxu1 }
 0x2cc   : > { %775 = vst [vmem:[#allocation3] sm:$0xff] %v770_v11  ;;  %777 = vst [vmem:[#allocation3 + $0x10] sm:$0xff] %v772_v12  ;;  %v771_v18 = vadd.f32 %v751_v16, %v681_v15  ;;  %v773_v19 = vadd.f32 %v759_v17, %v683_v22  ;;  %v1101_v20 = vpop.f32.mrb[3].mxu1  ;;  %v1097_v21 = vpop.f32.mrb[19].mxu0 }
 0x2ce   : > { %776 = vst [vmem:[#allocation3 + $0x8] sm:$0xff] %v771_v18  ;;  %778 = vst [vmem:[#allocation3 + $0x18] sm:$0xff] %v773_v19  ;;  %784 = sbr.rel (%p1034_p6) target bundleno = 753 (0x2f1), region = 127 }
 0x2d1   : > { %v764_v25 = vpop.f32.mrb[4].mxu1 }
 0x2d2   : > { %v774_v26 = vadd.f32 %v764_v25, %v684_v24  ;;  %v1104_v27 = vpop.f32.mrb[5].mxu1 }
 0x2d3   : > { %v767_v28 = vpop.f32.mrb[6].mxu1  ;;  %v789_v31 = vld [vmem:[#allocation3] sm:$0xff] (!%p1034_p6)  ;;  %v791_v34 = vld [vmem:[#allocation3 + $0x10] sm:$0xff] (!%p1034_p6) }
 0x2d4   : > { %779 = vst [vmem:[#allocation3 + $0x20] sm:$0xff] %v774_v26  ;;  %v1105_v29 = vpop.f32.mrb[7].mxu1 }
 0x2d5   : > { %v790_v33 = vld [vmem:[#allocation3 + $0x8] sm:$0xff]  ;;  %v792_v35 = vld [vmem:[#allocation3 + $0x18] sm:$0xff] }
 0x2db   : > { %v785_v30 = vld [vmem:[#allocation3 + $0x20] sm:$0x1] }
 0x2dc   : > { %1256 = vrcp.f32 %v785_v30 }
 0x2e6   : > { %v1257_v32 = vpop.eup %1256 }
 0x2e7   : > { %v796_v36 = vrot.slane %v1257_v32, %v1565_v63 }
 0x2e9   : > { %v797_v38 = vmul.f32 %v796_v36, %v789_v31  ;;  %v798_v40 = vmul.f32 %v796_v36, %v790_v33  ;;  %v799_v41 = vmul.f32 %v796_v36, %v791_v34  ;;  %v800_v42 = vmul.f32 %v796_v36, %v792_v35 }
 0x2eb   : > { %v802_v46 = vmul.f32 %v801_v37, %v797_v38  ;;  %v803_v47 = vmul.f32 %v801_v37, %v798_v40  ;;  %v804_v48 = vmul.f32 %v801_v37, %v799_v41  ;;  %v805_v49 = vmul.f32 %v801_v37, %v800_v42 }
 0x2ed   : > { %v810_v50 = vadd.f32 %v806_v39, %v802_v46  ;;  %v811_v51 = vadd.f32 %v807_v43, %v803_v47  ;;  %v812_v63 = vadd.f32 %v808_v44, %v804_v48  ;;  %v813_v52 = vadd.f32 %v809_v45, %v805_v49 }
 0x2ef   : > { %814 = vst [vmem:[%s1524_s27] sm:$0xff] %v810_v50  ;;  %815 = vst [vmem:[%s1524_s27 + $0x8] sm:$0xff] %v811_v51 }
 0x2f0   : > { %816 = vst [vmem:[%s1524_s27 + $0x10] sm:$0xff] %v812_v63  ;;  %817 = vst [vmem:[%s1524_s27 + $0x18] sm:$0xff] %v813_v52 }
 0x2f1 PF: > { %824 = sbr.rel (!%p1474_p9) target bundleno = 761 (0x2f9), region = 131  ;;  %s1036_s3 = sshll.u32 (%p1474_p9), %s1328_s26, 3 }
 0x2f2   : > { %s826_s24 = sadd.s32 (%p1474_p9), %s1324_s25, %s1036_s3 }
 0x2f3   : > { %s1037_s28 = sshll.u32 (%p1474_p9), %s826_s24, 3 }
 0x2f4   : > { %s828_s6 = scalar_lea.vmem (%p1474_p9), %s1662_s5, %s1037_s28 }
 0x2f6   : > { %v862_v53 = vld [vmem:[%s1524_s27] sm:$0xff] (%p1474_p9)  ;;  %v864_v54 = vld [vmem:[%s1524_s27 + $0x8] sm:$0xff] (%p1474_p9) }
 0x2f7   : > { %v866_v55 = vld [vmem:[%s1524_s27 + $0x10] sm:$0xff] (%p1474_p9)  ;;  %v868_v56 = vld [vmem:[%s1524_s27 + $0x18] sm:$0xff] (%p1474_p9)  ;;  %863 = vst [vmem:[%s828_s6] sm:$0xff] (%p1474_p9), %v862_v53  ;;  %865 = vst [vmem:[%s828_s6 + $0x10] sm:$0xff] (%p1474_p9), %v864_v54 }
 0x2f8   : > { %867 = vst [vmem:[%s828_s6 + $0x20] sm:$0xff] %v866_v55  ;;  %869 = vst [vmem:[%s828_s6 + $0x30] sm:$0xff] %v868_v56 }
 0x2f9 PF: > { %s16_s4 = sadd.s32 1, %s1344_s4   ;;  %s1682_s24 = sld [smem:[#allocation8_spill]] }
 0x2fa   : > { %p13_p7 = scmp.ge.s32.totalorder %s16_s4, 10   ;;  %s1683_s25 = sld [smem:[#allocation9_spill]] }
 0x2fb   : > { %s1684_s26 = sld [smem:[#allocation10_spill]]  ;;  %s1685_s27 = sld [smem:[#allocation11_spill]] }
 0x2fc   : > { %s1686_s28 = sld [smem:[#allocation12_spill]]  ;;  %s1687_s29 = sld [smem:[#allocation13_spill]] }
 0x2fd   : > { %s1688_s20 = smov %s1308_s21  ;;  %s1689_s21 = smov %s1485_s8 }
 0x2fe   : > { %s1690_s22 = smov %s1316_s23  ;;  %s1691_s23 = smov %s1482_s19 }
 0x2ff   :  { %15 = sbr.rel (!%p13_p7) target bundleno = 10 (0xa), region = 214 }

// kernel: change_guide_module.2
= control target key start
LH: loop header
LB: loop body
LE: loop exit
PB: predicated region body
PF: predicated region fallthrough
CT: control target
= control target key end

     0   :  { %s969_s21 = smov 0   ;;  %s971_s22 = smov 0   ;;  %s1048_s0 = inlined_call_operand.vmem [shape: bf16[2,32,256], index: 0, kind: input, shape index: {}]   ;;  %s1049_s1 = inlined_call_operand.vmem [shape: f32[2,1,256], index: 1, kind: input, shape index: {}]   ;;  %s1050_s2 = inlined_call_operand.vmem [shape: bf16[32,48], index: 2, kind: input, shape index: {}]   ;;  %s1051_s3 = inlined_call_operand.vmem [shape: f32[48,1], index: 3, kind: input, shape index: {}]   ;;  %s1052_s4 = inlined_call_operand.vmem [shape: bf16[2,8,256], index: 4, kind: output, shape index: {0}]   ;;  %s1053_s5 = inlined_call_operand.vmem [shape: bf16[2,8,256], index: 5, kind: output, shape index: {1}]   ;;  %s1054_s6 = inlined_call_operand.vmem [shape: bf16[2,40,256], index: 6, kind: output, shape index: {2}]  }
   0x1   :  { %s973_s23 = smov 0  }
   0x2 LB: > { %s29_s24 = sadd.s32 1, %s925_s22  ;;  %p829_p0 = scmp.ge.s32.totalorder %s929_s23, 1  ;;  %s929_s23 = sphi %s973_s23, %s17_s23   ;;  %s925_s22 = sphi %s971_s22, %s1056_s22   ;;  %s921_s21 = sphi %s969_s21, %s1055_s21  }
   0x3   : > { %p31_p1 = scmp.ge.s32.totalorder %s29_s24, 2  ;;  %p258_p2 = scmp.lt.s32.totalorder %s929_s23, 3 }
   0x5   : > { %s1058_s24 = smov (%p31_p1, %s29_s24), 0  ;;  %p259_p3 = pnand %p829_p0, %p258_p2 }
   0x6   : > { %v899_v0 = vld [vmem:[%s1050_s2] sm:$0xff] (!%p259_p3)   ;;  %p323_p4 = scmp.lt.s32.totalorder (!%p259_p3), %s921_s21, 1  ;;  %v900_v1 = vld [vmem:[%s1050_s2 + $0x8] sm:$0xff] (!%p259_p3)   ;;  %v931_v2 = vmov (!%p259_p3), 0   ;;  %v383_v9 = vld [vmem:[%s1051_s3 + $0x18] sm:$0xff] (!%p259_p3)  ;;  %vm464_vm0 = vcmask (!%p259_p3), 261120   ;;  %v539_v16 = vlaneseq (!%p259_p3) }
   0x7   : > { %262 = sbr.rel (%p259_p3) target bundleno = 344 (0x158), region = 36  ;;  %428 = vxpose.xlu0.c.b16.start [1/2] (short) (narrow) (!%p259_p3), %v899_v0, 48  ;;  %506 = vmatprep.mubr.bf16.mxu0 (!%p259_p3), %v931_v2  ;;  %v380_v3 = vld [vmem:[%s1051_s3] sm:$0xff] (!%p259_p3)  ;;  %v381_v7 = vld [vmem:[%s1051_s3 + $0x8] sm:$0xff] (!%p259_p3)  ;;  %v382_v11 = vld [vmem:[%s1051_s3 + $0x10] sm:$0xff] (!%p259_p3)  ;;  %v932_v18 = vmov (!%p259_p3), 0.0  }
   0x8   : > { %516 = vmatprep.mubr.bf16.mxu1 (!%p259_p3), %v931_v2  ;;  %897 = vset.pattern.permute.xlu1 (!%p259_p3), %v931_v2  ;;  %v384_v10 = vld [vmem:[%s1051_s3 + $0x20] sm:$0xff] (!%p259_p3)  ;;  %v385_v12 = vld [vmem:[%s1051_s3 + $0x28] sm:$0xff] (!%p259_p3)  ;;  %v540_v17 = vshrl.u32 (!%p259_p3), %v539_v16, 7  ;;  %v933_v20 = vmov (!%p259_p3), 839922192  }
   0x9   : > { %388 = vperm.xlu1 (!%p259_p3), %897, %v380_v3   ;;  %v615_v21 = vunpack.c.l.s4 (!%p259_p3), %v933_v20 }
   0xa   : > { %vm609_vm1 = vcmp.eq.s32.totalorder (!%p259_p3), %v540_v17, 0  ;;  %v541_v28 = vsub.s32 (!%p259_p3), 0, %v540_v17  ;;  %v545_v30 = vsub.s32 (!%p259_p3), 1, %v540_v17 }
   0xb   : > { %429 = vxpose.xlu0.c.b16.end [2/2] (short) (narrow) (!%p259_p3), %v900_v1, 48  ;;  %v853_v19 = vsel (!%p259_p3), %vm609_vm1, 1.0, %v932_v18  ;;  %v616_v23 = vunpack.c.0.s8 (!%p259_p3), %v615_v21 }
   0xc   : > { %v612_v22 = vpack.c.bf16 (!%p259_p3), %v853_v19, %v853_v19 }
   0xd   : > { %393 = vperm.xlu1 (!%p259_p3), %897, %v381_v7   ;;  %v619_v24 = vsub.s32 (!%p259_p3), %v616_v23, %v540_v17 }
   0xe   : > { %s1060_s21 = smov (!%p323_p4, %s921_s21), 1 }
   0xf   : > { %s856_s7 = sshll.u32 %s1060_s21, 5  ;;  %s869_s25 = smul.u32 40, %s1060_s21  ;;  %v620_v25 = vrot.slane %v612_v22, %v619_v24 }
  0x10   : > { %s330_s10 = scalar_lea.vmem %s1048_s0, %s856_s7  ;;  %s832_s29 = sshll.u32 %s1060_s21, 1 }
  0x11   : > { %v901_v4 = vld [vmem:[%s330_s10 + $0x4] ss:$8 sps:$4 sm:$0xff]   ;;  %v903_v5 = vld [vmem:[%s330_s10] ss:$8 sps:$4 sm:$0xff]   ;;  %v904_v6 = vld [vmem:[%s330_s10 + $0x14] ss:$8 sps:$4 sm:$0xff]   ;;  %403 = vperm.xlu1 %897, %v383_v9   ;;  %s1021_s28 = scalar_lea.vmem %s1054_s6, %s869_s25  ;;  %s339_s8 = scalar_lea.vmem %s1049_s1, %s832_s29 }
  0x12   : > { %474 = vmatprep.subr.bf16.mxu0 %v901_v4  ;;  %865 = vmatprep.subr.bf16.mxu1 %v901_v4  ;;  %v906_v8 = vld [vmem:[%s330_s10 + $0x10] ss:$8 sps:$4 sm:$0xff]   ;;  %622 = vst [vmem:[%s1021_s28 + $0x20] sm:$0xff] %v620_v25  ;;  %v537_v29 = vld [vmem:[%s339_s8] sm:$0x3]  ;;  %s857_s9 = sshll.u32 %s1060_s21, 3 }
  0x13   : > { %475 = vmatpush1.bf16.msra.mxu0 %v903_v5  ;;  %867 = vmatpush1.bf16.msra.mxu1 %v903_v5  ;;  %v542_v31 = vrot.slane %v537_v29, %v541_v28  ;;  %v546_v33 = vrot.slane %v537_v29, %v545_v30  ;;  %s349_s12 = scalar_lea.vmem %s1052_s4, %s857_s9  ;;  %s359_s14 = scalar_lea.vmem %s1053_s5, %s857_s9 }
  0x14   : > { %476 = vmatprep.subr.bf16.mxu0 %v904_v6  ;;  %866 = vmatprep.subr.bf16.mxu1 %v904_v6 }
  0x15   : > { %898 = vset.pattern.permute.xlu0 %v931_v2  ;;  %408 = vperm.xlu1 %897, %v384_v10  }
  0x17   : > { %477 = vmatpush1.bf16.msra.mxu0 %v906_v8  ;;  %868 = vmatpush1.bf16.msra.mxu1 %v906_v8 }
  0x18   : > { %398 = vperm.xlu0 %898, %v382_v11  }
  0x19   : > { %413 = vperm.xlu1 %897, %v385_v12  }
  0x6d   : > { %v436_v13 = vpop.trf.xlu0 }
  0x6e   : > { %844 = vmatmul.mubr.msk.bf16.vlgmr.msra.gmra.mrb[0].mxu0 %vm464_vm0, %v436_v13 }
  0x71   : > { %v437_v14 = vpop.trf.xlu0 }
  0x72   : > { %845 = vmatmul.mubr.msk.bf16.vlgmr.msra.gmra.mrb[0].mxu1 %vm464_vm0, %v437_v14 }
  0x73   : > { %526 = vmatprep.mubr.bf16.mxu1 %v931_v2 }
  0x75   : > { %v438_v15 = vpop.trf.xlu0 }
  0x7a   : > { %846 = vmatmul.mubr.msk.bf16.gmra.mrb[4].mxu1 %vm464_vm0, %v438_v15 }
  0x88   : > { %v389_v26 = vpop.permute.xlu1 %388 }
  0x8c   : > { %v394_v27 = vpop.permute.xlu1 %393 }
  0x90   : > { %v404_v34 = vpop.permute.xlu1 %403 }
  0x94   : > { %v409_v56 = vpop.permute.xlu1 %408 }
  0x97   : > { %v399_v39 = vpop.permute.xlu0 %398 }
  0x98   : > { %v414_v3 = vpop.permute.xlu1 %413 }
 0x141   : > { %v508_v32 = vpop.f32.mrb[0].mxu0 }
 0x142   : > { %v509_v35 = vadd.f32 %v508_v32, %v389_v26  ;;  %v510_v36 = vpop.f32.mrb[1].mxu0 }
 0x143   : > { %v511_v37 = vadd.f32 %v510_v36, %v389_v26  ;;  %v512_v38 = vpop.f32.mrb[2].mxu0 }
 0x144   : > { %v549_v40 = vmul.f32 %v542_v31, %v509_v35  ;;  %v513_v41 = vadd.f32 %v512_v38, %v394_v27  ;;  %v514_v42 = vpop.f32.mrb[3].mxu0 }
 0x145   : > { %v550_v43 = vmul.f32 %v546_v33, %v511_v37  ;;  %v515_v44 = vadd.f32 %v514_v42, %v394_v27  ;;  %v518_v45 = vpop.f32.mrb[0].mxu1 }
 0x146   : > { %v551_v46 = vmul.f32 %v542_v31, %v513_v41  ;;  %v519_v47 = vadd.f32 %v518_v45, %v399_v39  ;;  %v520_v48 = vpop.f32.mrb[1].mxu1 }
 0x147   : > { %v859_v49 = vpack.c.bf16 %v550_v43, %v549_v40  ;;  %v552_v50 = vmul.f32 %v546_v33, %v515_v44  ;;  %v521_v51 = vadd.f32 %v520_v48, %v399_v39  ;;  %v522_v52 = vpop.f32.mrb[2].mxu1 }
 0x148   : > { %v553_v53 = vmul.f32 %v542_v31, %v519_v47  ;;  %v523_v54 = vadd.f32 %v522_v52, %v404_v34  ;;  %v524_v55 = vpop.f32.mrb[3].mxu1 }
 0x149   : > { %569 = vst [vmem:[%s349_s12] sm:$0xff] %v859_v49  ;;  %v860_v57 = vpack.c.bf16 %v552_v50, %v551_v46  ;;  %v554_v58 = vmul.f32 %v546_v33, %v521_v51  ;;  %v525_v59 = vadd.f32 %v524_v55, %v404_v34 }
 0x14a   : > { %v555_v60 = vmul.f32 %v542_v31, %v523_v54 }
 0x14b   : > { %578 = vst [vmem:[%s359_s14] sm:$0xff] %v860_v57  ;;  %v861_v61 = vpack.c.bf16 %v554_v58, %v553_v53  ;;  %v556_v62 = vmul.f32 %v546_v33, %v525_v59 }
 0x14d   : > { %603 = vst [vmem:[%s1021_s28] sm:$0xff] %v861_v61  ;;  %v862_v63 = vpack.c.bf16 %v556_v62, %v555_v60  ;;  %v528_v0 = vpop.f32.mrb[4].mxu1 }
 0x14e   : > { %v529_v1 = vadd.f32 %v528_v0, %v409_v56  ;;  %v530_v2 = vpop.f32.mrb[5].mxu1 }
 0x14f   : > { %604 = vst [vmem:[%s1021_s28 + $0x8] sm:$0xff] %v862_v63  ;;  %v531_v4 = vadd.f32 %v530_v2, %v409_v56  ;;  %v532_v5 = vpop.f32.mrb[6].mxu1 }
 0x150   : > { %v557_v6 = vmul.f32 %v542_v31, %v529_v1  ;;  %v533_v7 = vadd.f32 %v532_v5, %v414_v3  ;;  %v534_v8 = vpop.f32.mrb[7].mxu1 }
 0x151   : > { %v558_v9 = vmul.f32 %v546_v33, %v531_v4  ;;  %v535_v10 = vadd.f32 %v534_v8, %v414_v3 }
 0x152   : > { %v559_v11 = vmul.f32 %v542_v31, %v533_v7 }
 0x153   : > { %v863_v12 = vpack.c.bf16 %v558_v9, %v557_v6  ;;  %v560_v13 = vmul.f32 %v546_v33, %v535_v10 }
 0x155   : > { %605 = vst [vmem:[%s1021_s28 + $0x10] sm:$0xff] %v863_v12  ;;  %v864_v14 = vpack.c.bf16 %v560_v13, %v559_v11 }
 0x157   : > { %606 = vst [vmem:[%s1021_s28 + $0x18] sm:$0xff] %v864_v14 }
 0x158 PF: > { %s17_s23 = sadd.s32 1, %s929_s23   ;;  %s1055_s21 = smov %s925_s22 }
 0x159   : > { %p14_p5 = scmp.ge.s32.totalorder %s17_s23, 4   ;;  %s1056_s22 = smov %s1058_s24 }
 0x15b   :  { %16 = sbr.rel (!%p14_p5) target bundleno = 2 (0x2), region = 93 }

</bundles_post_ra>
